<compile_context>
chip_gen: v7x
topology: tpu7x:2x2x1
jax: 0.10.0
libtpu: 0.0.40
codegen_flags: <defaults>
</compile_context>

<pallas_src>
import functools
import math

import jax
import jax.numpy as jnp
from jax.experimental import pallas as pl
from jax.experimental.pallas import tpu as pltpu


def _row_tile(m, cap=256):
    """Row-tile size: whole slab if small, else `cap` rows (pipelined over a grid)."""
    return m if m <= cap else cap


# ----------------------------------------------------------------------------
# Fused multi-output linear projection:  x @ [w0|w1|...] + [b0|b1|...]
# (reads the activation slab once, one MXU pass, splits outputs in-kernel)
# ----------------------------------------------------------------------------
def _fused_linear_kernel(x_ref, w_ref, b_ref, *out_refs, widths):
    acc = jnp.dot(x_ref[...], w_ref[...], preferred_element_type=jnp.float32)
    acc = acc + b_ref[...]
    off = 0
    for o_ref, n in zip(out_refs, widths):
        o_ref[...] = acc[:, off:off + n].astype(o_ref.dtype)
        off += n


def fused_linear(x2d, weights_and_biases):
    """Several linear heads sharing the same input, fused into one matmul."""
    M, K = x2d.shape
    widths = tuple(int(w.shape[1]) for w, _ in weights_and_biases)
    N = sum(widths)
    if len(weights_and_biases) == 1:
        w_cat = weights_and_biases[0][0]
        b_cat = weights_and_biases[0][1].reshape(1, N)
    else:
        w_cat = jnp.concatenate([w for w, _ in weights_and_biases], axis=1)
        b_cat = jnp.concatenate([b for _, b in weights_and_biases]).reshape(1, N)

    tm = _row_tile(M)
    kern = functools.partial(_fused_linear_kernel, widths=widths)
    return pl.pallas_call(
        kern,
        out_shape=tuple(jax.ShapeDtypeStruct((M, n), x2d.dtype) for n in widths),
        grid=(pl.cdiv(M, tm),),
        in_specs=[
            pl.BlockSpec((tm, K), lambda i: (i, 0)),
            pl.BlockSpec((K, N), lambda i: (0, 0)),
            pl.BlockSpec((1, N), lambda i: (0, 0)),
        ],
        out_specs=tuple(pl.BlockSpec((tm, n), lambda i: (i, 0)) for n in widths),
        compiler_params=pltpu.CompilerParams(dimension_semantics=("parallel",)),
    )(x2d, w_cat, b_cat)


# ----------------------------------------------------------------------------
# Scaled dot-product attention: one grid step = one batch element, all heads.
# Inputs stay in (B, L, H*d) layout -> no head-major HBM transposes needed.
# ----------------------------------------------------------------------------
def _mha_kernel(q_ref, k_ref, v_ref, bias_ref, ctx_ref, attn_ref, *,
                n_head, d_k, d_v, scale):
    q_all = q_ref[0]                      # (Lq, H*d_k)
    k_all = k_ref[0]                      # (Lk, H*d_k)
    v_all = v_ref[0]                      # (Lk, H*d_v)
    bias = bias_ref[0]                    # (1, Lk) additive mask (0 or -1e30)
    ctx_parts = []
    for h in range(n_head):
        q = q_all[:, h * d_k:(h + 1) * d_k]
        k = k_all[:, h * d_k:(h + 1) * d_k]
        v = v_all[:, h * d_v:(h + 1) * d_v]
        # scores = q @ k^T via contraction dims (no explicit transpose of K)
        s = jax.lax.dot_general(q, k, (((1,), (1,)), ((), ())),
                                preferred_element_type=jnp.float32)
        s = s * scale + bias
        m = jnp.max(s, axis=-1, keepdims=True)
        p = jnp.exp(s - m)
        denom = jnp.sum(p, axis=-1, keepdims=True)
        attn = p * pl.reciprocal(denom, approx=True)      # divide on the EUP
        ctx = jnp.dot(attn.astype(v.dtype), v, preferred_element_type=jnp.float32)
        attn_ref[h, 0] = attn.astype(attn_ref.dtype)
        ctx_parts.append(ctx)
    # single lane-dense store of the per-head contexts, already head-concatenated
    ctx_ref[0] = jnp.concatenate(ctx_parts, axis=-1).astype(ctx_ref.dtype)


def sdp_attention(qh, kh, vh, bias, n_head, d_k, d_v, temperature):
    """qh: (B,Lq,H*d_k), kh: (B,Lk,H*d_k), vh: (B,Lk,H*d_v), bias: (B,1,Lk)."""
    B, Lq, _ = qh.shape
    _, Lk, _ = kh.shape
    kern = functools.partial(_mha_kernel, n_head=n_head, d_k=d_k, d_v=d_v,
                             scale=1.0 / float(temperature))
    ctx, attn = pl.pallas_call(
        kern,
        out_shape=(
            jax.ShapeDtypeStruct((B, Lq, n_head * d_v), qh.dtype),
            jax.ShapeDtypeStruct((n_head, B, Lq, Lk), qh.dtype),
        ),
        grid=(B,),
        in_specs=[
            pl.BlockSpec((1, Lq, n_head * d_k), lambda b: (b, 0, 0)),
            pl.BlockSpec((1, Lk, n_head * d_k), lambda b: (b, 0, 0)),
            pl.BlockSpec((1, Lk, n_head * d_v), lambda b: (b, 0, 0)),
            pl.BlockSpec((1, 1, Lk), lambda b: (b, 0, 0)),   # untiled bias, re-read per step
        ],
        out_specs=(
            pl.BlockSpec((1, Lq, n_head * d_v), lambda b: (b, 0, 0)),
            pl.BlockSpec((n_head, 1, Lq, Lk), lambda b: (0, b, 0, 0)),
        ),
        compiler_params=pltpu.CompilerParams(dimension_semantics=("parallel",)),
    )(qh, kh, vh, bias)
    return ctx, attn


def _corr_kernel(q_ref, k_ref, o_ref, *, n_head, d_k):
    # `last=True` branch: sigmoid(q @ k^T), no scaling / mask / softmax.
    q_all = q_ref[0]
    k_all = k_ref[0]
    for h in range(n_head):
        q = q_all[:, h * d_k:(h + 1) * d_k]
        k = k_all[:, h * d_k:(h + 1) * d_k]
        s = jax.lax.dot_general(q, k, (((1,), (1,)), ((), ())),
                                preferred_element_type=jnp.float32)
        o_ref[h, 0] = jax.nn.sigmoid(s).astype(o_ref.dtype)


def correlation_attention(qh, kh, n_head, d_k):
    B, Lq, _ = qh.shape
    _, Lk, _ = kh.shape
    kern = functools.partial(_corr_kernel, n_head=n_head, d_k=d_k)
    return pl.pallas_call(
        kern,
        out_shape=jax.ShapeDtypeStruct((n_head, B, Lq, Lk), jnp.float32),
        grid=(B,),
        in_specs=[
            pl.BlockSpec((1, Lq, n_head * d_k), lambda b: (b, 0, 0)),
            pl.BlockSpec((1, Lk, n_head * d_k), lambda b: (b, 0, 0)),
        ],
        out_specs=pl.BlockSpec((n_head, 1, Lq, Lk), lambda b: (0, b, 0, 0)),
        compiler_params=pltpu.CompilerParams(dimension_semantics=("parallel",)),
    )(qh, kh)


# ----------------------------------------------------------------------------
# Fused epilogues
# ----------------------------------------------------------------------------
def _proj_ln_kernel(x_ref, r_ref, w_ref, b_ref, g_ref, beta_ref, o_ref):
    # LayerNorm(x @ w_fc + b_fc + residual), eps = 1e-5 (PyTorch default)
    y = jnp.dot(x_ref[...], w_ref[...], preferred_element_type=jnp.float32)
    y = y + b_ref[...] + r_ref[...].astype(jnp.float32)
    mean = jnp.mean(y, axis=-1, keepdims=True)
    var = jnp.mean(jnp.square(y - mean), axis=-1, keepdims=True)
    yn = (y - mean) * jax.lax.rsqrt(var + 1e-5)
    o_ref[...] = (yn * g_ref[...] + beta_ref[...]).astype(o_ref.dtype)


def proj_ln_residual(x2d, res2d, w, b, gamma, beta):
    M, K = x2d.shape
    _, D = w.shape
    tm = _row_tile(M)
    return pl.pallas_call(
        _proj_ln_kernel,
        out_shape=jax.ShapeDtypeStruct((M, D), res2d.dtype),
        grid=(pl.cdiv(M, tm),),
        in_specs=[
            pl.BlockSpec((tm, K), lambda i: (i, 0)),
            pl.BlockSpec((tm, D), lambda i: (i, 0)),
            pl.BlockSpec((K, D), lambda i: (0, 0)),
            pl.BlockSpec((1, D), lambda i: (0, 0)),
            pl.BlockSpec((1, D), lambda i: (0, 0)),
            pl.BlockSpec((1, D), lambda i: (0, 0)),
        ],
        out_specs=pl.BlockSpec((tm, D), lambda i: (i, 0)),
        compiler_params=pltpu.CompilerParams(dimension_semantics=("parallel",)),
    )(x2d, res2d, w, b.reshape(1, D), gamma.reshape(1, D), beta.reshape(1, D))


def _ffn_ln_kernel(x_ref, w1_ref, b1_ref, w2_ref, b2_ref, g_ref, beta_ref, o_ref):
    # LayerNorm(relu(x @ w1 + b1) @ w2 + b2 + x)   (Conv1d(k=1) == pointwise linear)
    x = x_ref[...]
    h = jnp.dot(x, w1_ref[...], preferred_element_type=jnp.float32) + b1_ref[...]
    h = jnp.maximum(h, 0.0).astype(x.dtype)
    y = jnp.dot(h, w2_ref[...], preferred_element_type=jnp.float32) + b2_ref[...]
    y = y + x.astype(jnp.float32)
    mean = jnp.mean(y, axis=-1, keepdims=True)
    var = jnp.mean(jnp.square(y - mean), axis=-1, keepdims=True)
    yn = (y - mean) * jax.lax.rsqrt(var + 1e-5)
    o_ref[...] = (yn * g_ref[...] + beta_ref[...]).astype(o_ref.dtype)


def ffn_ln_residual(x2d, w1, b1, w2, b2, gamma, beta):
    M, D = x2d.shape
    _, H = w1.shape
    tm = _row_tile(M)
    return pl.pallas_call(
        _ffn_ln_kernel,
        out_shape=jax.ShapeDtypeStruct((M, D), x2d.dtype),
        grid=(pl.cdiv(M, tm),),
        in_specs=[
            pl.BlockSpec((tm, D), lambda i: (i, 0)),
            pl.BlockSpec((D, H), lambda i: (0, 0)),
            pl.BlockSpec((1, H), lambda i: (0, 0)),
            pl.BlockSpec((H, D), lambda i: (0, 0)),
            pl.BlockSpec((1, D), lambda i: (0, 0)),
            pl.BlockSpec((1, D), lambda i: (0, 0)),
            pl.BlockSpec((1, D), lambda i: (0, 0)),
        ],
        out_specs=pl.BlockSpec((tm, D), lambda i: (i, 0)),
        compiler_params=pltpu.CompilerParams(
            dimension_semantics=("parallel",),
            vmem_limit_bytes=32 * 1024 * 1024,   # safe on v5e/v6e/v7x; raises v5e default
        ),
    )(x2d, w1, b1.reshape(1, H), w2, b2.reshape(1, D),
      gamma.reshape(1, D), beta.reshape(1, D))


# ----------------------------------------------------------------------------
# Module-level wrappers (JAX glue around the Pallas kernels)
# ----------------------------------------------------------------------------
def multi_head_attention(p, q, k, v, mask_bias=None, last=False):
    n_head, d_k, d_v = p["n_head"], p["d_k"], p["d_v"]
    B, Lq, d_model = q.shape
    _, Lk, _ = k.shape
    residual = q

    if (k is q) and (v is q):          # self-attention: one fused QKV matmul
        q2d, k2d, v2d = fused_linear(
            q.reshape(B * Lq, d_model),
            [(p["w_qs"], p["b_qs"]), (p["w_ks"], p["b_ks"]), (p["w_vs"], p["b_vs"])])
    elif v is k:                       # enc-dec attention: fused KV matmul
        (q2d,) = fused_linear(q.reshape(B * Lq, d_model), [(p["w_qs"], p["b_qs"])])
        k2d, v2d = fused_linear(
            k.reshape(B * Lk, d_model),
            [(p["w_ks"], p["b_ks"]), (p["w_vs"], p["b_vs"])])
    else:
        (q2d,) = fused_linear(q.reshape(B * Lq, d_model), [(p["w_qs"], p["b_qs"])])
        (k2d,) = fused_linear(k.reshape(B * Lk, d_model), [(p["w_ks"], p["b_ks"])])
        (v2d,) = fused_linear(v.reshape(B * Lk, d_model), [(p["w_vs"], p["b_vs"])])

    qh = q2d.reshape(B, Lq, n_head * d_k)
    kh = k2d.reshape(B, Lk, n_head * d_k)
    vh = v2d.reshape(B, Lk, n_head * d_v)

    if last:
        corr = correlation_attention(qh, kh, n_head, d_k)   # (H, B, Lq, Lk), head-major
        corr = corr.reshape(n_head * B, Lq, Lk)
        if Lq == 1:                                          # torch .squeeze(1)
            corr = jnp.squeeze(corr, axis=1)
        return corr, None

    if mask_bias is None:
        bias = jnp.zeros((B, 1, Lk), jnp.float32)
    else:
        bias = mask_bias                                     # (B, 1, Lk), no n_head tiling

    ctx, attn = sdp_attention(qh, kh, vh, bias, n_head, d_k, d_v,
                              temperature=math.sqrt(d_k))
    attn = attn.reshape(n_head * B, Lq, Lk)                  # head-major, matches torch

    # fc projection + dropout(identity) + residual + LayerNorm, fused in one kernel
    out2d = proj_ln_residual(ctx.reshape(B * Lq, n_head * d_v),
                             residual.reshape(B * Lq, d_model),
                             p["w_fc"], p["b_fc"], p["ln_g"], p["ln_b"])
    return out2d.reshape(B, Lq, d_model), attn


def decoder_layer(params, dec_input, enc_output, mask, last=False):
    """mask: (B, Lk) int, 1 = valid, 0 = pad (mirrors mask.unsqueeze(1).byte())."""
    slf_attn_mask = 1 - mask                                 # nonzero -> masked
    # Large finite negative instead of -inf: masked logits underflow to exactly 0
    # after softmax and fully-masked rows stay NaN-free.
    mask_bias = jnp.where(slf_attn_mask[:, None, :] != 0, -1e30, 0.0).astype(jnp.float32)

    dec_output, dec_slf_attn = multi_head_attention(
        params["slf_attn"], dec_input, dec_input, dec_input, mask_bias=None)
    dec_output, dec_enc_attn = multi_head_attention(
        params["enc_attn"], dec_output, enc_output, enc_output,
        mask_bias=mask_bias, last=last)
    if not last:
        B, L, D = dec_output.shape
        pf = params["pos_ffn"]
        dec_output = ffn_ln_residual(
            dec_output.reshape(B * L, D),
            pf["w1"], pf["b1"], pf["w2"], pf["b2"], pf["ln_g"], pf["ln_b"],
        ).reshape(B, L, D)
    return dec_output, dec_slf_attn, dec_enc_attn


# ----------------------------------------------------------------------------
# Deterministic parameter init (shapes follow the PyTorch __init__)
# ----------------------------------------------------------------------------
def init_mha_params(key, n_head, d_model, d_k, d_v):
    ks = jax.random.split(key, 8)
    std_qk = math.sqrt(2.0 / (d_model + d_k))
    std_v = math.sqrt(2.0 / (d_model + d_v))
    std_fc = math.sqrt(2.0 / (n_head * d_v + d_model))   # xavier_normal
    return dict(
        n_head=n_head, d_k=d_k, d_v=d_v,
        w_qs=jax.random.normal(ks[0], (d_model, n_head * d_k), jnp.float32) * std_qk,
        b_qs=jax.random.normal(ks[1], (n_head * d_k,), jnp.float32) * 0.02,
        w_ks=jax.random.normal(ks[2], (d_model, n_head * d_k), jnp.float32) * std_qk,
        b_ks=jax.random.normal(ks[3], (n_head * d_k,), jnp.float32) * 0.02,
        w_vs=jax.random.normal(ks[4], (d_model, n_head * d_v), jnp.float32) * std_v,
        b_vs=jax.random.normal(ks[5], (n_head * d_v,), jnp.float32) * 0.02,
        w_fc=jax.random.normal(ks[6], (n_head * d_v, d_model), jnp.float32) * std_fc,
        b_fc=jax.random.normal(ks[7], (d_model,), jnp.float32) * 0.02,
        ln_g=jnp.ones((d_model,), jnp.float32),
        ln_b=jnp.zeros((d_model,), jnp.float32),
    )


def init_ffn_params(key, d_model, d_inner):
    k1, k2, k3, k4 = jax.random.split(key, 4)
    lim1 = 1.0 / math.sqrt(d_model)
    lim2 = 1.0 / math.sqrt(d_inner)
    return dict(
        # Conv1d(d_model, d_inner, 1) weight (d_inner, d_model, 1) stored as (d_model, d_inner)
        w1=jax.random.uniform(k1, (d_model, d_inner), jnp.float32, -lim1, lim1),
        b1=jax.random.uniform(k2, (d_inner,), jnp.float32, -lim1, lim1),
        w2=jax.random.uniform(k3, (d_inner, d_model), jnp.float32, -lim2, lim2),
        b2=jax.random.uniform(k4, (d_model,), jnp.float32, -lim2, lim2),
        ln_g=jnp.ones((d_model,), jnp.float32),
        ln_b=jnp.zeros((d_model,), jnp.float32),
    )


def init_decoder_layer_params(key, d_model, d_inner, n_head, d_k, d_v, last=False):
    if last:
        n_head = 1
    k1, k2, k3 = jax.random.split(key, 3)
    return dict(
        slf_attn=init_mha_params(k1, n_head, d_model, d_k, d_v),
        enc_attn=init_mha_params(k2, n_head, d_model, d_k, d_v),
        pos_ffn=init_ffn_params(k3, d_model, d_inner),
    )


# ----------------------------------------------------------------------------
if __name__ == "__main__":
    B, L_dec, L_enc = 2, 8, 8
    d_model, d_inner, n_head, d_k, d_v = 32, 64, 2, 16, 16

    key = jax.random.PRNGKey(0)
    kp, kp2, kd, ke = jax.random.split(key, 4)

    params = init_decoder_layer_params(kp, d_model, d_inner, n_head, d_k, d_v, last=False)
    params_last = init_decoder_layer_params(kp2, d_model, d_inner, n_head, d_k, d_v, last=True)

    dec_input = jax.random.normal(kd, (B, L_dec, d_model), jnp.float32)
    enc_output = jax.random.normal(ke, (B, L_enc, d_model), jnp.float32)
    mask = jnp.ones((B, L_enc), jnp.int32).at[0, -2:].set(0)   # 1 = valid, 0 = pad

    # main path (last=False)
    dec_out, slf_attn, enc_attn = decoder_layer(params, dec_input, enc_output, mask, last=False)
    jax.block_until_ready((dec_out, slf_attn, enc_attn))

    assert dec_out.shape == (B, L_dec, d_model)
    assert slf_attn.shape == (n_head * B, L_dec, L_dec)
    assert enc_attn.shape == (n_head * B, L_dec, L_enc)
    assert bool(jnp.all(jnp.isfinite(dec_out)))
    # softmax rows ~sum to 1 (approx reciprocal -> loose tolerance)
    assert bool(jnp.allclose(jnp.sum(slf_attn, axis=-1), 1.0, atol=5e-2))
    # masked key positions (batch 0, head-major rows 0 and 2) get ~zero probability
    assert bool(jnp.all(enc_attn[jnp.array([0, 2]), :, -2:] < 1e-6))

    # last=True path (correlation head, n_head forced to 1, no FFN)
    corr, slf_attn_l, enc_attn_l = decoder_layer(params_last, dec_input, enc_output, mask, last=True)
    jax.block_until_ready((corr, slf_attn_l))
    assert corr.shape == (B, L_dec, L_enc)
    assert enc_attn_l is None
    assert bool(jnp.all((corr >= 0.0) & (corr <= 1.0)))

    print("KERNEL_OK")
</pallas_src>

<mosaic_0001>
module attributes {stable_mosaic.version = 11 : i64} {
  func.func @_fused_linear_kernel(%arg0: i32, %arg1: memref<16x32xf32, #tpu.memory_space<vmem>>, %arg2: memref<32x96xf32, #tpu.memory_space<vmem>>, %arg3: memref<1x96xf32, #tpu.memory_space<vmem>>, %arg4: memref<16x32xf32, #tpu.memory_space<vmem>>, %arg5: memref<16x32xf32, #tpu.memory_space<vmem>>, %arg6: memref<16x32xf32, #tpu.memory_space<vmem>>) attributes {dimension_semantics = [#tpu.dimension_semantics<parallel>], iteration_bounds = array<i64: 1>, scalar_prefetch = 0 : i64, scratch_operands = 0 : i64, tpu.core_type = #tpu.core_type<tc>, window_params = [{transform_indices = @transform_0, window_bounds = array<i64: 16, 32>}, {pipeline_mode = #tpu.pipeline_mode<synchronous>, transform_indices = @transform_1, window_bounds = array<i64: 32, 96>}, {pipeline_mode = #tpu.pipeline_mode<synchronous>, transform_indices = @transform_2, window_bounds = array<i64: 1, 96>}, {transform_indices = @transform_3, window_bounds = array<i64: 16, 32>}, {transform_indices = @transform_4, window_bounds = array<i64: 16, 32>}, {transform_indices = @transform_5, window_bounds = array<i64: 16, 32>}]} {
    %c0 = arith.constant 0 : index
    %c0_0 = arith.constant 0 : index
    %0 = vector.load %arg1[%c0, %c0_0] : memref<16x32xf32, #tpu.memory_space<vmem>>, vector<16x32xf32>
    %c0_1 = arith.constant 0 : index
    %c0_2 = arith.constant 0 : index
    %1 = vector.load %arg2[%c0_1, %c0_2] : memref<32x96xf32, #tpu.memory_space<vmem>>, vector<32x96xf32>
    %cst = arith.constant dense<0.000000e+00> : vector<16x96xf32>
    %2 = tpu.matmul %0, %1, %cst {dimension_numbers = #tpu.dot_dimension_numbers<[1], [0], [0], [1], [0, 0, 1, 1], [], []>} : vector<16x32xf32>, vector<32x96xf32>, vector<16x96xf32> -> vector<16x96xf32>
    %c0_3 = arith.constant 0 : index
    %c0_4 = arith.constant 0 : index
    %3 = vector.load %arg3[%c0_3, %c0_4] : memref<1x96xf32, #tpu.memory_space<vmem>>, vector<1x96xf32>
    %4 = vector.broadcast %3 : vector<1x96xf32> to vector<16x96xf32>
    %5 = arith.addf %2, %4 : vector<16x96xf32>
    %6 = vector.extract_strided_slice %5 {offsets = [0, 0], sizes = [16, 32], strides = [1, 1]} : vector<16x96xf32> to vector<16x32xf32>
    %c0_5 = arith.constant 0 : index
    %c0_6 = arith.constant 0 : index
    %7 = vector.load %arg4[%c0_5, %c0_6] : memref<16x32xf32, #tpu.memory_space<vmem>>, vector<16x32xf32>
    tpu.vector_store %arg4[%c0_5, %c0_6], %6 {strides = array<i32>} : memref<16x32xf32, #tpu.memory_space<vmem>>, vector<16x32xf32>,
    %8 = vector.extract_strided_slice %5 {offsets = [0, 32], sizes = [16, 32], strides = [1, 1]} : vector<16x96xf32> to vector<16x32xf32>
    %c0_7 = arith.constant 0 : index
    %c0_8 = arith.constant 0 : index
    %9 = vector.load %arg5[%c0_7, %c0_8] : memref<16x32xf32, #tpu.memory_space<vmem>>, vector<16x32xf32>
    tpu.vector_store %arg5[%c0_7, %c0_8], %8 {strides = array<i32>} : memref<16x32xf32, #tpu.memory_space<vmem>>, vector<16x32xf32>,
    %10 = vector.extract_strided_slice %5 {offsets = [0, 64], sizes = [16, 32], strides = [1, 1]} : vector<16x96xf32> to vector<16x32xf32>
    %c0_9 = arith.constant 0 : index
    %c0_10 = arith.constant 0 : index
    %11 = vector.load %arg6[%c0_9, %c0_10] : memref<16x32xf32, #tpu.memory_space<vmem>>, vector<16x32xf32>
    tpu.vector_store %arg6[%c0_9, %c0_10], %10 {strides = array<i32>} : memref<16x32xf32, #tpu.memory_space<vmem>>, vector<16x32xf32>,
    return
  }
  func.func @transform_0(%arg0: i32) -> (i32, i32) {
    %c0_i32 = arith.constant 0 : i32
    %c0_i32_0 = arith.constant 0 : i32
    return %arg0, %c0_i32 : i32, i32
  }
  func.func @transform_1(%arg0: i32) -> (i32, i32) {
    %c0_i32 = arith.constant 0 : i32
    %c0_i32_0 = arith.constant 0 : i32
    %c0_i32_1 = arith.constant 0 : i32
    return %c0_i32, %c0_i32_0 : i32, i32
  }
  func.func @transform_2(%arg0: i32) -> (i32, i32) {
    %c0_i32 = arith.constant 0 : i32
    %c0_i32_0 = arith.constant 0 : i32
    %c0_i32_1 = arith.constant 0 : i32
    return %c0_i32, %c0_i32_0 : i32, i32
  }
  func.func @transform_3(%arg0: i32) -> (i32, i32) {
    %c0_i32 = arith.constant 0 : i32
    %c0_i32_0 = arith.constant 0 : i32
    return %arg0, %c0_i32 : i32, i32
  }
  func.func @transform_4(%arg0: i32) -> (i32, i32) {
    %c0_i32 = arith.constant 0 : i32
    %c0_i32_0 = arith.constant 0 : i32
    return %arg0, %c0_i32 : i32, i32
  }
  func.func @transform_5(%arg0: i32) -> (i32, i32) {
    %c0_i32 = arith.constant 0 : i32
    %c0_i32_0 = arith.constant 0 : i32
    return %arg0, %c0_i32 : i32, i32
  }
}

</mosaic_0001>

<bundles_post_ra>
// kernel: tpu_custom_call.1
= control target key start
LH: loop header
LB: loop body
LE: loop exit
PB: predicated region body
PF: predicated region fallthrough
CT: control target
= control target key end

     0   :  { %11 = vsyncpa [#allocation3], 0  ;;  %s498_s0 = inlined_call_operand.hbm [shape: f32[16,32], index: 0, kind: input, shape index: {}]   ;;  %s499_s1 = inlined_call_operand.hbm [shape: f32[32,96], index: 1, kind: input, shape index: {}]   ;;  %s500_s2 = inlined_call_operand.vmem [shape: f32[1,96], index: 2, kind: input, shape index: {}]   ;;  %s501_s3 = inlined_call_operand.hbm [shape: f32[16,32], index: 3, kind: output, shape index: {0}]   ;;  %s502_s4 = inlined_call_operand.hbm [shape: f32[16,32], index: 4, kind: output, shape index: {1}]   ;;  %s503_s5 = inlined_call_operand.hbm [shape: f32[16,32], index: 5, kind: output, shape index: {2}]  }
   0x1   :  { %12 = vsyncpa [#allocation6], 0 }
   0x2   :  { %13 = vsyncpa [#allocation4], 0 }
   0x3   :  { %14 = vsyncpa [#allocation9], 0  ;;  %s366_s18 = smov [#allocation2]   ;;  %s248_s22 = scalar_lea.hbm %s498_s0, 256 }
   0x4   :  { %s20_s19 = sshll.u32 %s366_s18, 4  ;;  %p249_p0 = scmp.ne.s32.totalorder %s498_s0, %s248_s22  ;;  %s21_s19 = int_to_ptr.vmem [resolvable:$true] %s20_s19 }
   0x5   :  { %p252_p1 = scmp.lt.u32.totalorder %s248_s22, %s498_s0 }
   0x7   :  { %p254_p2 = pnand %p252_p1, %p249_p0 }
   0x9   :  { %257 = shalt.err (!%p254_p2)
}
   0xa   :  { %s258_s27 = scalar_lea.vmem %s21_s19, 256  ;;  %p263_p4 = scmp.lt.s32.totalorder %s21_s19, %s21_s19 }
   0xb   :  { %p259_p3 = scmp.ne.s32.totalorder %s21_s19, %s258_s27  ;;  %p264_p5 = scmp.lt.s32.totalorder %s258_s27, %s258_s27 }
   0xd   :  { %p265_p6 = por %p264_p5, %p263_p4 }
   0xf   :  { %p266_p7 = pnand %p265_p6, %p259_p3 }
  0x11   :  { %269 = shalt.err (!%p266_p7)
}
  0x12   :  { %s367_s28 = smov 128   ;;  %s368_s29 = smov 8  }
  0x13   :  { %26 = dma.hbm_to_vmem [thread:$0]  %s498_s0, 256, %s21_s19, [#allocation3], %s367_s28, %s367_s28, %s368_s29  }
  0x14   :  { %s369_s7 = smov [#allocation5]   ;;  %s270_s11 = scalar_lea.hbm %s499_s1, 512 }
  0x15   :  { %s32_s8 = sshll.u32 %s369_s7, 4  ;;  %p271_p8 = scmp.ne.s32.totalorder %s499_s1, %s270_s11  ;;  %s33_s8 = int_to_ptr.vmem [resolvable:$true] %s32_s8 }
  0x16   :  { %p274_p9 = scmp.lt.u32.totalorder %s270_s11, %s499_s1 }
  0x18   :  { %p276_p10 = pnand %p274_p9, %p271_p8 }
  0x1a   :  { %279 = shalt.err (!%p276_p10)
}
  0x1b   :  { %s280_s16 = scalar_lea.vmem %s33_s8, 512  ;;  %p285_p12 = scmp.lt.s32.totalorder %s33_s8, %s33_s8 }
  0x1c   :  { %p281_p11 = scmp.ne.s32.totalorder %s33_s8, %s280_s16  ;;  %p286_p13 = scmp.lt.s32.totalorder %s280_s16, %s280_s16 }
  0x1e   :  { %p287_p0 = por %p286_p13, %p285_p12 }
  0x20   :  { %p288_p1 = pnand %p287_p0, %p281_p11 }
  0x22   :  { %291 = shalt.err (!%p288_p1)
}
  0x23   :  { %38 = dma.hbm_to_vmem [thread:$0]  %s499_s1, 512, %s33_s8, [#allocation6], %s367_s28, %s367_s28, %s368_s29  }
  0x24   :  { %358 = dma.done.wait [#allocation3], 256  }
  0x25   :  { %359 = vsyncadd [#allocation3], 4294967040 }
  0x26   :  { %360 = dma.done.wait [#allocation6], 512  }
  0x27   :  { %361 = vsyncadd [#allocation6], 4294966784  ;;  %vm60_vm0 = vcmask 261120   ;;  %v49_v0 = vld [vmem:[#allocation5] sm:$0xff]  ;;  %v50_v1 = vld [vmem:[#allocation5 + $0x8] sm:$0xff]  ;;  %s370_s19 = smov [#allocation7]  }
  0x28   :  { %v51_v2 = vld [vmem:[#allocation5 + $0x10] sm:$0xff]  ;;  %v231_v3 = vpack.c.bf16 %v50_v1, %v49_v0  ;;  %v52_v4 = vld [vmem:[#allocation5 + $0x18] sm:$0xff]  ;;  %s167_s20 = sshll.u32 %s370_s19, 4  ;;  %s371_s21 = smov 64   ;;  %s168_s20 = int_to_ptr.vmem [resolvable:$true] %s167_s20 }
  0x29   :  { %v47_v5 = vld [vmem:[#allocation2] sm:$0xff]  ;;  %v235_v6 = vpack.c.bf16 %v52_v4, %v51_v2  ;;  %v48_v7 = vld [vmem:[#allocation2 + $0x8] sm:$0xff]  ;;  %s372_s22 = smov 96   ;;  %s292_s23 = scalar_lea.vmem %s168_s20, 256 }
  0x2a   :  { %228 = vmatprep.mubr.msk.f32.mxu0 %vm60_vm0, %v47_v5  ;;  %232 = vmatprep.subr.bf16.mxu0 %v231_v3  ;;  %v211_v8 = vld [vmem:[%s500_s2] ss:$0 sm:$0xff]  ;;  %p293_p2 = scmp.ne.s32.totalorder %s168_s20, %s292_s23  ;;  %p297_p3 = scmp.lt.s32.totalorder %s168_s20, %s168_s20 }
  0x2b   :  { %234 = vmatpush3.bf16.msra.mxu0 %v231_v3  ;;  %p298_p4 = scmp.lt.s32.totalorder %s292_s23, %s292_s23 }
  0x2c   :  { %236 = vmatprep.subr.bf16.mxu0 %v235_v6 }
  0x2d   :  { %p299_p5 = por %p298_p4, %p297_p3 }
  0x2f   :  { %238 = vmatpush3.bf16.msra.mxu0 %v235_v6  ;;  %p300_p6 = pnand %p299_p5, %p293_p2 }
  0x32   :  { %229 = vmatmul.mubr.msk.f32.vlgmr.msra.gmra.mrb[0].mxu0 %vm60_vm0, %v48_v7 }
 0x105   :  { %v230_v9 = vpop.f32.mrb[0].mxu0 }
 0x106   :  { %v139_v10 = vadd.f32 %v230_v9, %v211_v8  ;;  %v133_v11 = vpop.f32.mrb[1].mxu0 }
 0x107   :  { %v134_v12 = vadd.f32 %v211_v8, %v133_v11 }
 0x108   :  { %143 = vst.msk [vmem:[#allocation7 + $0x8] sm:$0xff] %vm60_vm0, %v139_v10 }
 0x109   :  { %142 = vst.msk [vmem:[#allocation7] sm:$0xff] %vm60_vm0, %v134_v12  ;;  %154 = vrot.lane.b32.xlu1 %v134_v12, %s371_s21  ;;  %146 = vrot.lane.b32.xlu0 %v134_v12, %s372_s22 }
 0x10a   :  { %303 = shalt.err (!%p300_p6)
}
 0x10b   :  { %s304_s25 = scalar_lea.hbm %s501_s3, 256 }
 0x10c   :  { %p305_p7 = scmp.ne.s32.totalorder %s501_s3, %s304_s25  ;;  %p308_p8 = scmp.lt.u32.totalorder %s304_s25, %s501_s3 }
 0x10e   :  { %p310_p9 = pnand %p308_p8, %p305_p7 }
 0x110   :  { %313 = shalt.err (!%p310_p9)
}
 0x111   :  { %173 = dma.vmem_to_hbm [thread:$0]  %s168_s20, 256, %s501_s3, [#allocation4], %s367_s28, %s367_s28, %s368_s29  }
 0x112   :  { %156 = vrot.lane.b32.xlu1 %v139_v10, %s371_s21  ;;  %148 = vrot.lane.b32.xlu0 %v139_v10, %s372_s22  ;;  %s373_s9 = smov [#allocation8]   ;;  %s374_s11 = smov [#allocation10]  }
 0x113   :  { %s179_s10 = sshll.u32 %s373_s9, 4  ;;  %s191_s12 = sshll.u32 %s374_s11, 4  ;;  %s180_s10 = int_to_ptr.vmem [resolvable:$true] %s179_s10  ;;  %s459_s12 = int_to_ptr.vmem [resolvable:$true] %s191_s12 }
 0x114   :  { %s314_s3 = scalar_lea.vmem %s180_s10, 256  ;;  %p319_p11 = scmp.lt.s32.totalorder %s180_s10, %s180_s10 }
 0x115   :  { %p315_p10 = scmp.ne.s32.totalorder %s180_s10, %s314_s3  ;;  %p320_p12 = scmp.lt.s32.totalorder %s314_s3, %s314_s3 }
 0x117   :  { %p321_p13 = por %p320_p12, %p319_p11 }
 0x119   :  { %p322_p0 = pnand %p321_p13, %p315_p10 }
 0x17b   :  { %v155_v13 = vpop.permute.xlu1 %154  ;;  %v147_v14 = vpop.permute.xlu0 %146 }
 0x17c   :  { %160 = vst.msk [vmem:[#allocation10] sm:$0xff] %vm60_vm0, %v155_v13  ;;  %152 = vst.msk [vmem:[#allocation8] sm:$0xff] %vm60_vm0, %v147_v14 }
 0x184   :  { %v157_v15 = vpop.permute.xlu1 %156  ;;  %v149_v16 = vpop.permute.xlu0 %148 }
 0x185   :  { %161 = vst.msk [vmem:[#allocation10 + $0x8] sm:$0xff] %vm60_vm0, %v157_v15  ;;  %153 = vst.msk [vmem:[#allocation8 + $0x8] sm:$0xff] %vm60_vm0, %v149_v16 }
 0x186   :  { %325 = shalt.err (!%p322_p0)
}
 0x187   :  { %s326_s15 = scalar_lea.hbm %s502_s4, 256 }
 0x188   :  { %p327_p1 = scmp.ne.s32.totalorder %s502_s4, %s326_s15  ;;  %p330_p2 = scmp.lt.u32.totalorder %s326_s15, %s502_s4 }
 0x18a   :  { %p332_p3 = pnand %p330_p2, %p327_p1 }
 0x18c   :  { %335 = shalt.err (!%p332_p3)
}
 0x18d   :  { %185 = dma.vmem_to_hbm [thread:$0]  %s180_s10, 256, %s502_s4, [#allocation9], %s367_s28, %s367_s28, %s368_s29  }
 0x18e   :  { %s336_s20 = scalar_lea.vmem %s459_s12, 256  ;;  %p341_p5 = scmp.lt.s32.totalorder %s459_s12, %s459_s12 }
 0x18f   :  { %p337_p4 = scmp.ne.s32.totalorder %s459_s12, %s336_s20  ;;  %p342_p6 = scmp.lt.s32.totalorder %s336_s20, %s336_s20 }
 0x191   :  { %p343_p7 = por %p342_p6, %p341_p5 }
 0x193   :  { %p344_p8 = pnand %p343_p7, %p337_p4 }
 0x195   :  { %347 = shalt.err (!%p344_p8)
}
 0x196   :  { %s348_s23 = scalar_lea.hbm %s503_s5, 256 }
 0x197   :  { %p349_p9 = scmp.ne.s32.totalorder %s503_s5, %s348_s23  ;;  %p352_p10 = scmp.lt.u32.totalorder %s348_s23, %s503_s5 }
 0x199   :  { %p354_p11 = pnand %p352_p10, %p349_p9 }
 0x19b   :  { %357 = shalt.err (!%p354_p11)
}
 0x19c   :  { %197 = dma.vmem_to_hbm [thread:$0]  %s459_s12, 256, %s503_s5, [#allocation9], %s367_s28, %s367_s28, %s368_s29  }
 0x19d   :  { %362 = dma.done.wait [#allocation4], 256  }
 0x19e   :  { %363 = vsyncadd [#allocation4], 4294967040 }
 0x19f   :  { %364 = dma.done.wait [#allocation9], 512  }
 0x1a0   :  { %365 = vsyncadd [#allocation9], 4294966784 }
 0x1a1   :  { %207 = vsyncpa [#allocation3], 1 }
 0x1a2   :  { %208 = vsyncpa [#allocation6], 1 }
 0x1a3   :  { %209 = vsyncpa [#allocation4], 1 }
 0x1a4   :  { %210 = vsyncpa [#allocation9], 1 }

</bundles_post_ra>
